<compile_context>
chip_gen: v6e
topology: v6e:2x2x1
jax: 0.10.0
libtpu: 0.0.40
codegen_flags: <defaults>
</compile_context>

<pallas_src>
import functools

import jax
import jax.numpy as jnp
import numpy as np
from jax.experimental import pallas as pl
from jax.experimental.pallas import tpu as pltpu


def minvar_kernel(x_ref, w_ref, aug_ref, *, n):
    G, T, _ = x_ref.shape
    S = n + 2                              # n+1 KKT rows/cols + 1 RHS column
    x = x_ref[...]                         # (G, T, n) float32

    # --- covariance estimator: unbiased sample covariance over time ---------
    xc = x - jnp.mean(x, axis=1, keepdims=True)                   # (G, T, n)
    cov = jnp.einsum("gti,gtj->gij", xc, xc,
                     preferred_element_type=jnp.float32) / float(T - 1)

    # --- assemble augmented KKT system [A | B] in a (G, S, S) VMEM tile -----
    # rows 0..n-1 / cols 0..n-1 : cov
    # row  n,  cols 0..n-1      : +1
    # rows 0..n-1, col n        : -1
    # col  n+1 is the RHS (1 in row n); row n+1 is a harmless all-zero row.
    r = jax.lax.broadcasted_iota(jnp.int32, (1, S, S), 1)
    c = jax.lax.broadcasted_iota(jnp.int32, (1, S, S), 2)
    border = (jnp.where((r == n) & (c < n), 1.0, 0.0)
              + jnp.where((r < n) & (c == n), -1.0, 0.0)
              + jnp.where((r == n) & (c == n + 1), 1.0, 0.0))     # (1, S, S)
    aug_ref[...] = jnp.broadcast_to(border, (G, S, S))
    aug_ref[:, 0:n, 0:n] = cov             # in-VMEM embed (replaces host pad)
    aug0 = aug_ref[...]

    # --- masked Gauss-Jordan elimination, vectorized over the G portfolios --
    cl = jax.lax.broadcasted_iota(jnp.int32, (1, 1, S), 2)

    def gj_step(k, a):
        row_mask = r == k                                         # (1, S, S)
        col_mask = c == k
        pivot_row = jnp.sum(jnp.where(row_mask, a, 0.0),
                            axis=1, keepdims=True)                # (G, 1, S)
        # Pivot comes from the already-extracted row (1 reduce, not 2).
        pivot = jnp.sum(jnp.where(cl == k, pivot_row, 0.0),
                        axis=2, keepdims=True)                    # (G, 1, 1)
        norm_row = pivot_row * pl.reciprocal(pivot)               # exact (EUP)
        col_k = jnp.sum(jnp.where(col_mask, a, 0.0),
                        axis=2, keepdims=True)                    # (G, S, 1)
        return jnp.where(row_mask, norm_row, a - col_k * norm_row)

    aug = jax.lax.fori_loop(0, n + 1, gj_step, aug0, unroll=True)

    # Solution lives in column n+1 (rows 0..n-1).  Extract it lane-dense via a
    # masked lane-reduce -> (G, S); the first n entries are the weights.
    sol = jnp.sum(jnp.where(c == n + 1, aug, 0.0), axis=2)        # (G, S)
    w_ref[0] = sol[:, 0:n]                                        # (G, n)


def _pick_block_g(b, block_g):
    g = min(block_g, b)
    if b > 1:                # keep >= 2 grid steps so both v7x TCs get work
        g = min(g, pl.cdiv(b, 2))
    return max(g, 1)


def min_variance(x, n, *, block_g=8):
    """x: (batch, T, n) -> min-variance target weights, shape (batch, n, 1).

    `block_g` portfolios are solved per grid step.  The input block costs
    roughly 2 * block_g * T * 128 * 4 bytes of VMEM (lane-padded, double
    buffered) -- shrink block_g for very large T (especially on v7x, 64 MiB).
    """
    b, T, n_in = x.shape
    assert n_in == n
    x = x.astype(jnp.float32)

    G = _pick_block_g(b, block_g)
    nb = pl.cdiv(b, G)
    b_pad = nb * G
    if b_pad != b:
        # Pad the batch by repeating leading portfolios (keeps every padded
        # KKT system nonsingular); the extra rows are sliced off below.
        x = jnp.concatenate([x, x[: b_pad - b]], axis=0)
    S = n + 2

    out = pl.pallas_call(
        functools.partial(minvar_kernel, n=n),
        out_shape=jax.ShapeDtypeStruct((nb, G, n), jnp.float32),
        grid_spec=pltpu.PrefetchScalarGridSpec(
            num_scalar_prefetch=0,
            grid=(nb,),
            in_specs=[pl.BlockSpec((G, T, n), lambda i: (i, 0, 0))],
            out_specs=pl.BlockSpec((1, G, n), lambda i: (i, 0, 0)),
            scratch_shapes=[pltpu.VMEM((G, S, S), jnp.float32)],
        ),
        compiler_params=pltpu.CompilerParams(
            dimension_semantics=("parallel",),
        ),
    )(x)

    # Lane-dense slab -> module's (batch, n, 1) layout.
    return out.reshape(b_pad, n)[:b].reshape(b, n, 1)


def reference_min_variance(x, n):
    """Pure-JAX replica of the PyTorch forward (same cov estimator)."""
    b, T, _ = x.shape
    xc = x - jnp.mean(x, axis=1, keepdims=True)
    cov = jnp.einsum("bti,btj->bij", xc, xc) / (T - 1)
    A = jnp.zeros((b, n + 1, n + 1), jnp.float32)
    A = A.at[:, n, 0:n].set(1.0)
    A = A.at[:, 0:n, n].set(-1.0)
    A = A.at[:, 0:n, 0:n].set(cov)
    B = jnp.zeros((b, n + 1, 1), jnp.float32)
    B = B.at[:, n].set(1.0)
    sol = jnp.linalg.solve(A, B)
    return sol[:, 0:n]


if __name__ == "__main__":
    key = jax.random.PRNGKey(0)
    batch, T, n = 8, 16, 4          # 8 portfolios, 16 returns, 4 assets
    x = jax.random.normal(key, (batch, T, n), dtype=jnp.float32)

    out = min_variance(x, n)
    jax.block_until_ready(out)

    ref = reference_min_variance(x, n)
    assert out.shape == (batch, n, 1)
    np.testing.assert_allclose(np.asarray(out), np.asarray(ref), rtol=1e-4, atol=1e-4)
    print("KERNEL_OK")
</pallas_src>

<mosaic_0001>
module attributes {stable_mosaic.version = 11 : i64} {
  func.func @minvar_kernel(%arg0: i32, %arg1: memref<4x16x4xf32, #tpu.memory_space<vmem>>, %arg2: memref<1x4x4xf32, #tpu.memory_space<vmem>>, %arg3: memref<4x6x6xf32, #tpu.memory_space<vmem>>) attributes {dimension_semantics = [#tpu.dimension_semantics<parallel>], iteration_bounds = array<i64: 2>, scalar_prefetch = 0 : i64, scratch_operands = 1 : i64, tpu.core_type = #tpu.core_type<tc>, window_params = [{transform_indices = @transform_0, window_bounds = array<i64: 4, 16, 4>}, {transform_indices = @transform_1, window_bounds = array<i64: 1, 4, 4>}]} {
    %c0 = arith.constant 0 : index
    %c0_0 = arith.constant 0 : index
    %c0_1 = arith.constant 0 : index
    %0 = vector.load %arg1[%c0, %c0_0, %c0_1] : memref<4x16x4xf32, #tpu.memory_space<vmem>>, vector<4x16x4xf32>
    %cst = arith.constant dense<0.000000e+00> : vector<4x4xf32>
    %1 = vector.multi_reduction <add>, %0, %cst [1] : vector<4x16x4xf32> to vector<4x4xf32>
    %2 = vector.shape_cast %1 : vector<4x4xf32> to vector<4x1x4xf32>
    %cst_2 = arith.constant 1.600000e+01 : f32
    %3 = vector.broadcast %cst_2 : f32 to vector<4x1x4xf32>
    %4 = arith.divf %2, %3 : vector<4x1x4xf32>
    %5 = vector.broadcast %4 : vector<4x1x4xf32> to vector<4x16x4xf32>
    %6 = arith.subf %0, %5 : vector<4x16x4xf32>
    "tpu.trace_start"() <{level = 10 : i32, message = "gti,gtj->gij"}> : () -> ()
    %cst_3 = arith.constant dense<0.000000e+00> : vector<4x4x4xf32>
    %7 = tpu.matmul %6, %6, %cst_3 {dimension_numbers = #tpu.dot_dimension_numbers<[1], [1], [2], [2], [0, 0, 0, 2, 1, 2], [0], [0]>} : vector<4x16x4xf32>, vector<4x16x4xf32>, vector<4x4x4xf32> -> vector<4x4x4xf32>
    "tpu.trace_stop"() : () -> ()
    %cst_4 = arith.constant 1.500000e+01 : f32
    %8 = vector.broadcast %cst_4 : f32 to vector<4x4x4xf32>
    %9 = arith.divf %7, %8 : vector<4x4x4xf32>
    %10 = tpu.iota {dimensions = array<i32: 1>} : vector<1x6x6xi32>
    %11 = tpu.iota {dimensions = array<i32: 2>} : vector<1x6x6xi32>
    %c4_i32 = arith.constant 4 : i32
    %12 = vector.broadcast %c4_i32 : i32 to vector<1x6x6xi32>
    %13 = arith.cmpi eq, %10, %12 : vector<1x6x6xi32>
    %c4_i32_5 = arith.constant 4 : i32
    %14 = vector.broadcast %c4_i32_5 : i32 to vector<1x6x6xi32>
    %15 = arith.cmpi slt, %11, %14 : vector<1x6x6xi32>
    %16 = arith.andi %13, %15 : vector<1x6x6xi1>
    %cst_6 = arith.constant 1.000000e+00 : f32
    %cst_7 = arith.constant 0.000000e+00 : f32
    %17 = vector.broadcast %cst_6 : f32 to vector<1x6x6xf32>
    %18 = vector.broadcast %cst_7 : f32 to vector<1x6x6xf32>
    %19 = arith.select %16, %17, %18 : vector<1x6x6xi1>, vector<1x6x6xf32>
    %c4_i32_8 = arith.constant 4 : i32
    %20 = vector.broadcast %c4_i32_8 : i32 to vector<1x6x6xi32>
    %21 = arith.cmpi slt, %10, %20 : vector<1x6x6xi32>
    %c4_i32_9 = arith.constant 4 : i32
    %22 = vector.broadcast %c4_i32_9 : i32 to vector<1x6x6xi32>
    %23 = arith.cmpi eq, %11, %22 : vector<1x6x6xi32>
    %24 = arith.andi %21, %23 : vector<1x6x6xi1>
    %cst_10 = arith.constant -1.000000e+00 : f32
    %cst_11 = arith.constant 0.000000e+00 : f32
    %25 = vector.broadcast %cst_10 : f32 to vector<1x6x6xf32>
    %26 = vector.broadcast %cst_11 : f32 to vector<1x6x6xf32>
    %27 = arith.select %24, %25, %26 : vector<1x6x6xi1>, vector<1x6x6xf32>
    %28 = arith.addf %19, %27 : vector<1x6x6xf32>
    %c4_i32_12 = arith.constant 4 : i32
    %29 = vector.broadcast %c4_i32_12 : i32 to vector<1x6x6xi32>
    %30 = arith.cmpi eq, %10, %29 : vector<1x6x6xi32>
    %c5_i32 = arith.constant 5 : i32
    %31 = vector.broadcast %c5_i32 : i32 to vector<1x6x6xi32>
    %32 = arith.cmpi eq, %11, %31 : vector<1x6x6xi32>
    %33 = arith.andi %30, %32 : vector<1x6x6xi1>
    %cst_13 = arith.constant 1.000000e+00 : f32
    %cst_14 = arith.constant 0.000000e+00 : f32
    %34 = vector.broadcast %cst_13 : f32 to vector<1x6x6xf32>
    %35 = vector.broadcast %cst_14 : f32 to vector<1x6x6xf32>
    %36 = arith.select %33, %34, %35 : vector<1x6x6xi1>, vector<1x6x6xf32>
    %37 = arith.addf %28, %36 : vector<1x6x6xf32>
    %38 = vector.shape_cast %37 : vector<1x6x6xf32> to vector<1x6x6xf32>
    %39 = vector.broadcast %38 : vector<1x6x6xf32> to vector<4x6x6xf32>
    %c0_15 = arith.constant 0 : index
    %c0_16 = arith.constant 0 : index
    %c0_17 = arith.constant 0 : index
    %40 = vector.load %arg3[%c0_15, %c0_16, %c0_17] : memref<4x6x6xf32, #tpu.memory_space<vmem>>, vector<4x6x6xf32>
    tpu.vector_store %arg3[%c0_15, %c0_16, %c0_17], %39 {strides = array<i32>} : memref<4x6x6xf32, #tpu.memory_space<vmem>>, vector<4x6x6xf32>,
    %c0_18 = arith.constant 0 : index
    %c0_19 = arith.constant 0 : index
    %c0_20 = arith.constant 0 : index
    %41 = vector.load %arg3[%c0_18, %c0_19, %c0_20] : memref<4x6x6xf32, #tpu.memory_space<vmem>>, vector<4x4x4xf32>
    tpu.vector_store %arg3[%c0_18, %c0_19, %c0_20], %9 {strides = array<i32>} : memref<4x6x6xf32, #tpu.memory_space<vmem>>, vector<4x4x4xf32>,
    %c0_21 = arith.constant 0 : index
    %c0_22 = arith.constant 0 : index
    %c0_23 = arith.constant 0 : index
    %42 = vector.load %arg3[%c0_21, %c0_22, %c0_23] : memref<4x6x6xf32, #tpu.memory_space<vmem>>, vector<4x6x6xf32>
    %43 = tpu.iota {dimensions = array<i32: 2>} : vector<1x1x6xi32>
    %c0_i32 = arith.constant 0 : i32
    %44 = vector.broadcast %c0_i32 : i32 to vector<1x6x6xi32>
    %45 = arith.cmpi eq, %10, %44 : vector<1x6x6xi32>
    %46 = vector.broadcast %c0_i32 : i32 to vector<1x6x6xi32>
    %47 = arith.cmpi eq, %11, %46 : vector<1x6x6xi32>
    %cst_24 = arith.constant 0.000000e+00 : f32
    %48 = vector.shape_cast %45 : vector<1x6x6xi1> to vector<1x6x6xi1>
    %49 = vector.broadcast %48 : vector<1x6x6xi1> to vector<4x6x6xi1>
    %50 = vector.broadcast %cst_24 : f32 to vector<4x6x6xf32>
    %51 = arith.select %49, %42, %50 : vector<4x6x6xi1>, vector<4x6x6xf32>
    %cst_25 = arith.constant dense<0.000000e+00> : vector<4x6xf32>
    %52 = vector.multi_reduction <add>, %51, %cst_25 [1] : vector<4x6x6xf32> to vector<4x6xf32>
    %53 = vector.shape_cast %52 : vector<4x6xf32> to vector<4x1x6xf32>
    %54 = vector.broadcast %c0_i32 : i32 to vector<1x1x6xi32>
    %55 = arith.cmpi eq, %43, %54 : vector<1x1x6xi32>
    %cst_26 = arith.constant 0.000000e+00 : f32
    %56 = vector.shape_cast %55 : vector<1x1x6xi1> to vector<1x1x6xi1>
    %57 = vector.broadcast %56 : vector<1x1x6xi1> to vector<4x1x6xi1>
    %58 = vector.broadcast %cst_26 : f32 to vector<4x1x6xf32>
    %59 = arith.select %57, %53, %58 : vector<4x1x6xi1>, vector<4x1x6xf32>
    %cst_27 = arith.constant dense<0.000000e+00> : vector<4x1xf32>
    %60 = vector.multi_reduction <add>, %59, %cst_27 [2] : vector<4x1x6xf32> to vector<4x1xf32>
    %61 = vector.shape_cast %60 : vector<4x1xf32> to vector<4x1x1xf32>
    %62 = tpu.reciprocal %61 : vector<4x1x1xf32> -> vector<4x1x1xf32>
    %63 = vector.broadcast %62 : vector<4x1x1xf32> to vector<4x1x6xf32>
    %64 = arith.mulf %53, %63 : vector<4x1x6xf32>
    %cst_28 = arith.constant 0.000000e+00 : f32
    %65 = vector.shape_cast %47 : vector<1x6x6xi1> to vector<1x6x6xi1>
    %66 = vector.broadcast %65 : vector<1x6x6xi1> to vector<4x6x6xi1>
    %67 = vector.broadcast %cst_28 : f32 to vector<4x6x6xf32>
    %68 = arith.select %66, %42, %67 : vector<4x6x6xi1>, vector<4x6x6xf32>
    %cst_29 = arith.constant dense<0.000000e+00> : vector<4x6xf32>
    %69 = vector.multi_reduction <add>, %68, %cst_29 [2] : vector<4x6x6xf32> to vector<4x6xf32>
    %70 = vector.shape_cast %69 : vector<4x6xf32> to vector<4x6x1xf32>
    %71 = vector.broadcast %70 : vector<4x6x1xf32> to vector<4x6x6xf32>
    %72 = vector.broadcast %64 : vector<4x1x6xf32> to vector<4x6x6xf32>
    %73 = arith.mulf %71, %72 : vector<4x6x6xf32>
    %74 = arith.subf %42, %73 : vector<4x6x6xf32>
    %75 = vector.shape_cast %45 : vector<1x6x6xi1> to vector<1x6x6xi1>
    %76 = vector.broadcast %75 : vector<1x6x6xi1> to vector<4x6x6xi1>
    %77 = vector.shape_cast %64 : vector<4x1x6xf32> to vector<4x1x6xf32>
    %78 = vector.broadcast %77 : vector<4x1x6xf32> to vector<4x6x6xf32>
    %79 = arith.select %76, %78, %74 : vector<4x6x6xi1>, vector<4x6x6xf32>
    %c1_i32 = arith.constant 1 : i32
    %80 = vector.broadcast %c1_i32 : i32 to vector<1x6x6xi32>
    %81 = arith.cmpi eq, %10, %80 : vector<1x6x6xi32>
    %82 = vector.broadcast %c1_i32 : i32 to vector<1x6x6xi32>
    %83 = arith.cmpi eq, %11, %82 : vector<1x6x6xi32>
    %cst_30 = arith.constant 0.000000e+00 : f32
    %84 = vector.shape_cast %81 : vector<1x6x6xi1> to vector<1x6x6xi1>
    %85 = vector.broadcast %84 : vector<1x6x6xi1> to vector<4x6x6xi1>
    %86 = vector.broadcast %cst_30 : f32 to vector<4x6x6xf32>
    %87 = arith.select %85, %79, %86 : vector<4x6x6xi1>, vector<4x6x6xf32>
    %cst_31 = arith.constant dense<0.000000e+00> : vector<4x6xf32>
    %88 = vector.multi_reduction <add>, %87, %cst_31 [1] : vector<4x6x6xf32> to vector<4x6xf32>
    %89 = vector.shape_cast %88 : vector<4x6xf32> to vector<4x1x6xf32>
    %90 = vector.broadcast %c1_i32 : i32 to vector<1x1x6xi32>
    %91 = arith.cmpi eq, %43, %90 : vector<1x1x6xi32>
    %cst_32 = arith.constant 0.000000e+00 : f32
    %92 = vector.shape_cast %91 : vector<1x1x6xi1> to vector<1x1x6xi1>
    %93 = vector.broadcast %92 : vector<1x1x6xi1> to vector<4x1x6xi1>
    %94 = vector.broadcast %cst_32 : f32 to vector<4x1x6xf32>
    %95 = arith.select %93, %89, %94 : vector<4x1x6xi1>, vector<4x1x6xf32>
    %cst_33 = arith.constant dense<0.000000e+00> : vector<4x1xf32>
    %96 = vector.multi_reduction <add>, %95, %cst_33 [2] : vector<4x1x6xf32> to vector<4x1xf32>
    %97 = vector.shape_cast %96 : vector<4x1xf32> to vector<4x1x1xf32>
    %98 = tpu.reciprocal %97 : vector<4x1x1xf32> -> vector<4x1x1xf32>
    %99 = vector.broadcast %98 : vector<4x1x1xf32> to vector<4x1x6xf32>
    %100 = arith.mulf %89, %99 : vector<4x1x6xf32>
    %cst_34 = arith.constant 0.000000e+00 : f32
    %101 = vector.shape_cast %83 : vector<1x6x6xi1> to vector<1x6x6xi1>
    %102 = vector.broadcast %101 : vector<1x6x6xi1> to vector<4x6x6xi1>
    %103 = vector.broadcast %cst_34 : f32 to vector<4x6x6xf32>
    %104 = arith.select %102, %79, %103 : vector<4x6x6xi1>, vector<4x6x6xf32>
    %cst_35 = arith.constant dense<0.000000e+00> : vector<4x6xf32>
    %105 = vector.multi_reduction <add>, %104, %cst_35 [2] : vector<4x6x6xf32> to vector<4x6xf32>
    %106 = vector.shape_cast %105 : vector<4x6xf32> to vector<4x6x1xf32>
    %107 = vector.broadcast %106 : vector<4x6x1xf32> to vector<4x6x6xf32>
    %108 = vector.broadcast %100 : vector<4x1x6xf32> to vector<4x6x6xf32>
    %109 = arith.mulf %107, %108 : vector<4x6x6xf32>
    %110 = arith.subf %79, %109 : vector<4x6x6xf32>
    %111 = vector.shape_cast %81 : vector<1x6x6xi1> to vector<1x6x6xi1>
    %112 = vector.broadcast %111 : vector<1x6x6xi1> to vector<4x6x6xi1>
    %113 = vector.shape_cast %100 : vector<4x1x6xf32> to vector<4x1x6xf32>
    %114 = vector.broadcast %113 : vector<4x1x6xf32> to vector<4x6x6xf32>
    %115 = arith.select %112, %114, %110 : vector<4x6x6xi1>, vector<4x6x6xf32>
    %c2_i32 = arith.constant 2 : i32
    %116 = vector.broadcast %c2_i32 : i32 to vector<1x6x6xi32>
    %117 = arith.cmpi eq, %10, %116 : vector<1x6x6xi32>
    %118 = vector.broadcast %c2_i32 : i32 to vector<1x6x6xi32>
    %119 = arith.cmpi eq, %11, %118 : vector<1x6x6xi32>
    %cst_36 = arith.constant 0.000000e+00 : f32
    %120 = vector.shape_cast %117 : vector<1x6x6xi1> to vector<1x6x6xi1>
    %121 = vector.broadcast %120 : vector<1x6x6xi1> to vector<4x6x6xi1>
    %122 = vector.broadcast %cst_36 : f32 to vector<4x6x6xf32>
    %123 = arith.select %121, %115, %122 : vector<4x6x6xi1>, vector<4x6x6xf32>
    %cst_37 = arith.constant dense<0.000000e+00> : vector<4x6xf32>
    %124 = vector.multi_reduction <add>, %123, %cst_37 [1] : vector<4x6x6xf32> to vector<4x6xf32>
    %125 = vector.shape_cast %124 : vector<4x6xf32> to vector<4x1x6xf32>
    %126 = vector.broadcast %c2_i32 : i32 to vector<1x1x6xi32>
    %127 = arith.cmpi eq, %43, %126 : vector<1x1x6xi32>
    %cst_38 = arith.constant 0.000000e+00 : f32
    %128 = vector.shape_cast %127 : vector<1x1x6xi1> to vector<1x1x6xi1>
    %129 = vector.broadcast %128 : vector<1x1x6xi1> to vector<4x1x6xi1>
    %130 = vector.broadcast %cst_38 : f32 to vector<4x1x6xf32>
    %131 = arith.select %129, %125, %130 : vector<4x1x6xi1>, vector<4x1x6xf32>
    %cst_39 = arith.constant dense<0.000000e+00> : vector<4x1xf32>
    %132 = vector.multi_reduction <add>, %131, %cst_39 [2] : vector<4x1x6xf32> to vector<4x1xf32>
    %133 = vector.shape_cast %132 : vector<4x1xf32> to vector<4x1x1xf32>
    %134 = tpu.reciprocal %133 : vector<4x1x1xf32> -> vector<4x1x1xf32>
    %135 = vector.broadcast %134 : vector<4x1x1xf32> to vector<4x1x6xf32>
    %136 = arith.mulf %125, %135 : vector<4x1x6xf32>
    %cst_40 = arith.constant 0.000000e+00 : f32
    %137 = vector.shape_cast %119 : vector<1x6x6xi1> to vector<1x6x6xi1>
    %138 = vector.broadcast %137 : vector<1x6x6xi1> to vector<4x6x6xi1>
    %139 = vector.broadcast %cst_40 : f32 to vector<4x6x6xf32>
    %140 = arith.select %138, %115, %139 : vector<4x6x6xi1>, vector<4x6x6xf32>
    %cst_41 = arith.constant dense<0.000000e+00> : vector<4x6xf32>
    %141 = vector.multi_reduction <add>, %140, %cst_41 [2] : vector<4x6x6xf32> to vector<4x6xf32>
    %142 = vector.shape_cast %141 : vector<4x6xf32> to vector<4x6x1xf32>
    %143 = vector.broadcast %142 : vector<4x6x1xf32> to vector<4x6x6xf32>
    %144 = vector.broadcast %136 : vector<4x1x6xf32> to vector<4x6x6xf32>
    %145 = arith.mulf %143, %144 : vector<4x6x6xf32>
    %146 = arith.subf %115, %145 : vector<4x6x6xf32>
    %147 = vector.shape_cast %117 : vector<1x6x6xi1> to vector<1x6x6xi1>
    %148 = vector.broadcast %147 : vector<1x6x6xi1> to vector<4x6x6xi1>
    %149 = vector.shape_cast %136 : vector<4x1x6xf32> to vector<4x1x6xf32>
    %150 = vector.broadcast %149 : vector<4x1x6xf32> to vector<4x6x6xf32>
    %151 = arith.select %148, %150, %146 : vector<4x6x6xi1>, vector<4x6x6xf32>
    %c3_i32 = arith.constant 3 : i32
    %152 = vector.broadcast %c3_i32 : i32 to vector<1x6x6xi32>
    %153 = arith.cmpi eq, %10, %152 : vector<1x6x6xi32>
    %154 = vector.broadcast %c3_i32 : i32 to vector<1x6x6xi32>
    %155 = arith.cmpi eq, %11, %154 : vector<1x6x6xi32>
    %cst_42 = arith.constant 0.000000e+00 : f32
    %156 = vector.shape_cast %153 : vector<1x6x6xi1> to vector<1x6x6xi1>
    %157 = vector.broadcast %156 : vector<1x6x6xi1> to vector<4x6x6xi1>
    %158 = vector.broadcast %cst_42 : f32 to vector<4x6x6xf32>
    %159 = arith.select %157, %151, %158 : vector<4x6x6xi1>, vector<4x6x6xf32>
    %cst_43 = arith.constant dense<0.000000e+00> : vector<4x6xf32>
    %160 = vector.multi_reduction <add>, %159, %cst_43 [1] : vector<4x6x6xf32> to vector<4x6xf32>
    %161 = vector.shape_cast %160 : vector<4x6xf32> to vector<4x1x6xf32>
    %162 = vector.broadcast %c3_i32 : i32 to vector<1x1x6xi32>
    %163 = arith.cmpi eq, %43, %162 : vector<1x1x6xi32>
    %cst_44 = arith.constant 0.000000e+00 : f32
    %164 = vector.shape_cast %163 : vector<1x1x6xi1> to vector<1x1x6xi1>
    %165 = vector.broadcast %164 : vector<1x1x6xi1> to vector<4x1x6xi1>
    %166 = vector.broadcast %cst_44 : f32 to vector<4x1x6xf32>
    %167 = arith.select %165, %161, %166 : vector<4x1x6xi1>, vector<4x1x6xf32>
    %cst_45 = arith.constant dense<0.000000e+00> : vector<4x1xf32>
    %168 = vector.multi_reduction <add>, %167, %cst_45 [2] : vector<4x1x6xf32> to vector<4x1xf32>
    %169 = vector.shape_cast %168 : vector<4x1xf32> to vector<4x1x1xf32>
    %170 = tpu.reciprocal %169 : vector<4x1x1xf32> -> vector<4x1x1xf32>
    %171 = vector.broadcast %170 : vector<4x1x1xf32> to vector<4x1x6xf32>
    %172 = arith.mulf %161, %171 : vector<4x1x6xf32>
    %cst_46 = arith.constant 0.000000e+00 : f32
    %173 = vector.shape_cast %155 : vector<1x6x6xi1> to vector<1x6x6xi1>
    %174 = vector.broadcast %173 : vector<1x6x6xi1> to vector<4x6x6xi1>
    %175 = vector.broadcast %cst_46 : f32 to vector<4x6x6xf32>
    %176 = arith.select %174, %151, %175 : vector<4x6x6xi1>, vector<4x6x6xf32>
    %cst_47 = arith.constant dense<0.000000e+00> : vector<4x6xf32>
    %177 = vector.multi_reduction <add>, %176, %cst_47 [2] : vector<4x6x6xf32> to vector<4x6xf32>
    %178 = vector.shape_cast %177 : vector<4x6xf32> to vector<4x6x1xf32>
    %179 = vector.broadcast %178 : vector<4x6x1xf32> to vector<4x6x6xf32>
    %180 = vector.broadcast %172 : vector<4x1x6xf32> to vector<4x6x6xf32>
    %181 = arith.mulf %179, %180 : vector<4x6x6xf32>
    %182 = arith.subf %151, %181 : vector<4x6x6xf32>
    %183 = vector.shape_cast %153 : vector<1x6x6xi1> to vector<1x6x6xi1>
    %184 = vector.broadcast %183 : vector<1x6x6xi1> to vector<4x6x6xi1>
    %185 = vector.shape_cast %172 : vector<4x1x6xf32> to vector<4x1x6xf32>
    %186 = vector.broadcast %185 : vector<4x1x6xf32> to vector<4x6x6xf32>
    %187 = arith.select %184, %186, %182 : vector<4x6x6xi1>, vector<4x6x6xf32>
    %c4_i32_48 = arith.constant 4 : i32
    %188 = vector.broadcast %c4_i32_48 : i32 to vector<1x6x6xi32>
    %189 = arith.cmpi eq, %10, %188 : vector<1x6x6xi32>
    %190 = vector.broadcast %c4_i32_48 : i32 to vector<1x6x6xi32>
    %191 = arith.cmpi eq, %11, %190 : vector<1x6x6xi32>
    %cst_49 = arith.constant 0.000000e+00 : f32
    %192 = vector.shape_cast %189 : vector<1x6x6xi1> to vector<1x6x6xi1>
    %193 = vector.broadcast %192 : vector<1x6x6xi1> to vector<4x6x6xi1>
    %194 = vector.broadcast %cst_49 : f32 to vector<4x6x6xf32>
    %195 = arith.select %193, %187, %194 : vector<4x6x6xi1>, vector<4x6x6xf32>
    %cst_50 = arith.constant dense<0.000000e+00> : vector<4x6xf32>
    %196 = vector.multi_reduction <add>, %195, %cst_50 [1] : vector<4x6x6xf32> to vector<4x6xf32>
    %197 = vector.shape_cast %196 : vector<4x6xf32> to vector<4x1x6xf32>
    %198 = vector.broadcast %c4_i32_48 : i32 to vector<1x1x6xi32>
    %199 = arith.cmpi eq, %43, %198 : vector<1x1x6xi32>
    %cst_51 = arith.constant 0.000000e+00 : f32
    %200 = vector.shape_cast %199 : vector<1x1x6xi1> to vector<1x1x6xi1>
    %201 = vector.broadcast %200 : vector<1x1x6xi1> to vector<4x1x6xi1>
    %202 = vector.broadcast %cst_51 : f32 to vector<4x1x6xf32>
    %203 = arith.select %201, %197, %202 : vector<4x1x6xi1>, vector<4x1x6xf32>
    %cst_52 = arith.constant dense<0.000000e+00> : vector<4x1xf32>
    %204 = vector.multi_reduction <add>, %203, %cst_52 [2] : vector<4x1x6xf32> to vector<4x1xf32>
    %205 = vector.shape_cast %204 : vector<4x1xf32> to vector<4x1x1xf32>
    %206 = tpu.reciprocal %205 : vector<4x1x1xf32> -> vector<4x1x1xf32>
    %207 = vector.broadcast %206 : vector<4x1x1xf32> to vector<4x1x6xf32>
    %208 = arith.mulf %197, %207 : vector<4x1x6xf32>
    %cst_53 = arith.constant 0.000000e+00 : f32
    %209 = vector.shape_cast %191 : vector<1x6x6xi1> to vector<1x6x6xi1>
    %210 = vector.broadcast %209 : vector<1x6x6xi1> to vector<4x6x6xi1>
    %211 = vector.broadcast %cst_53 : f32 to vector<4x6x6xf32>
    %212 = arith.select %210, %187, %211 : vector<4x6x6xi1>, vector<4x6x6xf32>
    %cst_54 = arith.constant dense<0.000000e+00> : vector<4x6xf32>
    %213 = vector.multi_reduction <add>, %212, %cst_54 [2] : vector<4x6x6xf32> to vector<4x6xf32>
    %214 = vector.shape_cast %213 : vector<4x6xf32> to vector<4x6x1xf32>
    %215 = vector.broadcast %214 : vector<4x6x1xf32> to vector<4x6x6xf32>
    %216 = vector.broadcast %208 : vector<4x1x6xf32> to vector<4x6x6xf32>
    %217 = arith.mulf %215, %216 : vector<4x6x6xf32>
    %218 = arith.subf %187, %217 : vector<4x6x6xf32>
    %219 = vector.shape_cast %189 : vector<1x6x6xi1> to vector<1x6x6xi1>
    %220 = vector.broadcast %219 : vector<1x6x6xi1> to vector<4x6x6xi1>
    %221 = vector.shape_cast %208 : vector<4x1x6xf32> to vector<4x1x6xf32>
    %222 = vector.broadcast %221 : vector<4x1x6xf32> to vector<4x6x6xf32>
    %223 = arith.select %220, %222, %218 : vector<4x6x6xi1>, vector<4x6x6xf32>
    %c5_i32_55 = arith.constant 5 : i32
    %c5_i32_56 = arith.constant 5 : i32
    %224 = vector.broadcast %c5_i32_56 : i32 to vector<1x6x6xi32>
    %225 = arith.cmpi eq, %11, %224 : vector<1x6x6xi32>
    %cst_57 = arith.constant 0.000000e+00 : f32
    %226 = vector.shape_cast %225 : vector<1x6x6xi1> to vector<1x6x6xi1>
    %227 = vector.broadcast %226 : vector<1x6x6xi1> to vector<4x6x6xi1>
    %228 = vector.broadcast %cst_57 : f32 to vector<4x6x6xf32>
    %229 = arith.select %227, %223, %228 : vector<4x6x6xi1>, vector<4x6x6xf32>
    %cst_58 = arith.constant dense<0.000000e+00> : vector<4x6xf32>
    %230 = vector.multi_reduction <add>, %229, %cst_58 [2] : vector<4x6x6xf32> to vector<4x6xf32>
    %231 = vector.extract_strided_slice %230 {offsets = [0, 0], sizes = [4, 4], strides = [1, 1]} : vector<4x6xf32> to vector<4x4xf32>
    %c0_59 = arith.constant 0 : index
    %c0_60 = arith.constant 0 : index
    %c0_61 = arith.constant 0 : index
    %232 = vector.load %arg2[%c0_59, %c0_60, %c0_61] : memref<1x4x4xf32, #tpu.memory_space<vmem>>, vector<1x4x4xf32>
    %233 = vector.shape_cast %232 : vector<1x4x4xf32> to vector<4x4xf32>
    %234 = vector.shape_cast %231 : vector<4x4xf32> to vector<1x4x4xf32>
    tpu.vector_store %arg2[%c0_59, %c0_60, %c0_61], %234 {strides = array<i32>} : memref<1x4x4xf32, #tpu.memory_space<vmem>>, vector<1x4x4xf32>,
    return
  }
  func.func @transform_0(%arg0: i32) -> (i32, i32, i32) {
    %c0_i32 = arith.constant 0 : i32
    %c0_i32_0 = arith.constant 0 : i32
    %c0_i32_1 = arith.constant 0 : i32
    return %arg0, %c0_i32, %c0_i32_0 : i32, i32, i32
  }
  func.func @transform_1(%arg0: i32) -> (i32, i32, i32) {
    %c0_i32 = arith.constant 0 : i32
    %c0_i32_0 = arith.constant 0 : i32
    %c0_i32_1 = arith.constant 0 : i32
    return %arg0, %c0_i32, %c0_i32_0 : i32, i32, i32
  }
}

</mosaic_0001>

<bundles_post_ra>
// kernel: tpu_custom_call.1
= control target key start
LH: loop header
LB: loop body
LE: loop exit
PB: predicated region body
PF: predicated region fallthrough
CT: control target
= control target key end

     0   :  { %6 = vsyncpa [#allocation4], 0  ;;  %s1907_s0 = inlined_call_operand.vmem [shape: f32[8,16,4], index: 0, kind: input, shape index: {}]   ;;  %s1908_s1 = inlined_call_operand.hbm [shape: f32[2,4,4], index: 1, kind: output, shape index: {}]  }
   0x1   :  { %8 = vsyncpa [#allocation4 + $0x1], 0  ;;  %s1416_s6 = smov 0   ;;  %s1418_s7 = smov 0  }
   0x2   :  { %s1420_s8 = smov 0   ;;  %s1422_s9 = smov 0  }
   0x3 LB: > { %s1437_s10 = sadd.s32 4294967295, %s1401_s9   ;;  %s1203_s11 = sadd.s32 4294967294, %s1401_s9   ;;  %s1401_s9 = sphi %s1422_s9, %s1914_s9   ;;  %s1397_s8 = sphi %s1420_s8, %s1913_s8   ;;  %s1393_s7 = sphi %s1418_s7, %s1912_s7   ;;  %s1389_s6 = sphi %s1416_s6, %s1911_s6  }
   0x4   : > { %s1441_s12 = sadd.s32 1, %s1401_s9   ;;  %s47_s13 = sadd.s32 1, %s1397_s8 }
   0x5   : > { %s44_s14 = ssub.s32 %s1401_s9, %s1441_s12  ;;  %p57_p0 = scmp.ne.s32.totalorder %s1397_s8, %s1393_s7 }
   0x6   : > { %p45_p1 = scmp.eq.s32.totalorder %s44_s14, 0  ;;  %p58_p2 = scmp.eq.s32.totalorder %s1437_s10, 1 }
   0x7   : > { %p63_p3 = scmp.ne.s32.totalorder %s1393_s7, %s1389_s6  ;;  %p64_p4 = scmp.eq.s32.totalorder %s1203_s11, 1 }
   0x8   : > { %s1452_s15 = scalar_select %p45_p1, %s1397_s8, %s47_s13  }
   0x9   : > { %p1454_p5 = por %p58_p2, %p57_p0  ;;  %p1458_p6 = por %p64_p4, %p63_p3 }
   0xa   : > { %p1206_p7 = scmp.ge.s32.totalorder %s1401_s9, 1  ;;  %p92_p8 = scmp.lt.s32.totalorder %s1401_s9, 3 }
   0xc   : > { %p93_p9 = pnand %p1206_p7, %p92_p8 }
   0xd   : > { %s1208_s18 = sshll.u32 (!%p93_p9), %s1437_s10, 2  ;;  %s110_s23 = sand.u32 (!%p93_p9), 1, %s1393_s7  }
   0xe   : > { %96 = sbr.rel (%p93_p9) target bundleno = 1414 (0x586), region = 24  ;;  %p114_p10 = scmp.lt.s32.totalorder (!%p93_p9), %s1208_s18, 7 }
   0xf   : > { %s1207_s24 = sshll.u32 (!%p93_p9), %s110_s23, 2  ;;  %s1216_s25 = sshll.u32 (!%p93_p9), %s1437_s10, 6 }
  0x10   : > { %s112_s26 = scalar_lea.vmem (!%p93_p9), [#allocation3], %s1207_s24  ;;  %s1871_s30 = scalar_lea.hbm (!%p93_p9), %s1908_s1, %s1216_s25 }
  0x11   : > { %s1144_s27 = sshll.u32 (!%p93_p9), %s112_s26, 4  ;;  %s1131_s2 = scalar_lea.sflag (!%p93_p9), [#allocation4], %s110_s23  ;;  %s1145_s27 = int_to_ptr.vmem [resolvable:$true] %s1144_s27 }
  0x12   : > { %s1341_s3 = scalar_lea.vmem (!%p93_p9), %s1145_s27, 64  ;;  %s1405_s4 = smov (!%p93_p9), [#allocation3]  }
  0x13   : > { %v1403_v0 = vmov 0.0   ;;  %vm1404_vm0 = vmmov 0   ;;  %s1916_s18 = smov (!%p114_p10, %s1208_s18), 7  ;;  %vm128_vm1 = vcmask 31744   ;;  %vm210_vm2 = vcmask 130048   ;;  %p1342_p11 = scmp.ne.s32.totalorder %s1145_s27, %s1341_s3 }
  0x14   : > { %1232 = vmatprep.subr.mxu0 %v1403_v0  ;;  %1239 = vmatprep.subr.mxu1 %v1403_v0  ;;  %s1219_s19 = sshll.u32 %s1916_s18, 4  ;;  %v604_v61 = vlaneseq  ;;  %vm621_vm11 = vcmask 46080   ;;  %vm626_vm12 = vcmask 27648   ;;  %vm677_vm14 = vcmask 48128   ;;  %s1345_s5 = sshll.u32 %s1405_s4, 4  ;;  %s1346_s5 = int_to_ptr.vmem [resolvable:$false] %s1345_s5 }
  0x15   : > { %1236 = vmatprep.mubr.msk.f32.mxu0 %vm1404_vm0, %v1403_v0  ;;  %1243 = vmatprep.mubr.msk.f32.mxu1 %vm1404_vm0, %v1403_v0  ;;  %s118_s22 = scalar_lea.vmem %s1907_s0, %s1219_s19  ;;  %p1343_p12 = pnand %p1342_p11, %p1454_p5 }
  0x16   : > { %v122_v1 = vld [vmem:[%s118_s22 + $0x10] sm:$0xff]  ;;  %v123_v2 = vld [vmem:[%s118_s22 + $0x18] sm:$0xff]  ;;  %v120_v3 = vld [vmem:[%s118_s22] sm:$0xff]  ;;  %v1496_v62 = vshrl.u32 %v604_v61, 7  ;;  %v1498_v63 = vand.u32 127, %v604_v61  ;;  %s1347_s10 = scalar_lea.vmem %s1346_s5, 128  ;;  %p1348_p0 = scmp.lt.s32.totalorder %s1145_s27, %s1346_s5 }
  0x17   : > { %v138_v4 = vsel %vm128_vm1, %v122_v1, 0.0  ;;  %v139_v5 = vsel %vm128_vm1, %v123_v2, 0.0  ;;  %v121_v6 = vld [vmem:[%s118_s22 + $0x8] sm:$0xff]  ;;  %v129_v7 = vsel %vm128_vm1, %v120_v3, 0.0  ;;  %v126_v8 = vld [vmem:[%s118_s22 + $0x30] sm:$0xff]  ;;  %v127_v9 = vld [vmem:[%s118_s22 + $0x38] sm:$0xff]  ;;  %p1344_p13 = pneg %p1343_p12  ;;  %p1349_p1 = scmp.lt.s32.totalorder %s1347_s10, %s1341_s3 }
  0x18   : > { %v140_v10 = vadd.f32 %v139_v5, %v138_v4  ;;  %v130_v11 = vsel %vm128_vm1, %v121_v6, 0.0  ;;  %v156_v12 = vsel %vm128_vm1, %v126_v8, 0.0  ;;  %v157_v13 = vsel %vm128_vm1, %v127_v9, 0.0  ;;  %v124_v14 = vld [vmem:[%s118_s22 + $0x20] sm:$0xff]  ;;  %v125_v15 = vld [vmem:[%s118_s22 + $0x28] sm:$0xff] }
  0x19   : > { %v131_v16 = vadd.f32 %v130_v11, %v129_v7  ;;  %v158_v17 = vadd.f32 %v157_v13, %v156_v12  ;;  %v147_v18 = vsel %vm128_vm1, %v124_v14, 0.0  ;;  %v148_v19 = vsel %vm128_vm1, %v125_v15, 0.0  ;;  %p1350_p2 = por %p1349_p1, %p1348_p0 }
  0x1a   : > { %v141_v20 = vrot.slane %v140_v10, 4  ;;  %v149_v21 = vadd.f32 %v148_v19, %v147_v18  ;;  %vm608_vm3 = vcmp.eq.s32.totalorder %v1496_v62, 4  ;;  %vm609_vm4 = vcmp.lt.s32.totalorder %v1498_v63, 4 }
  0x1b   : > { %v132_v22 = vrot.slane %v131_v16, 4  ;;  %v159_v23 = vrot.slane %v158_v17, 4  ;;  %vm612_vm5 = vcmp.lt.s32.totalorder %v1496_v62, 4  ;;  %vm613_vm6 = vcmp.eq.s32.totalorder %v1498_v63, 4  ;;  %vm610_vm7 = vmand %vm608_vm3, %vm609_vm4  ;;  %p1351_p3 = pnand %p1350_p2, %p1344_p13 }
  0x1c   : > { %v142_v24 = vadd.f32 %v141_v20, %v140_v10  ;;  %v150_v25 = vrot.slane %v149_v21, 4  ;;  %vm614_vm8 = vmand %vm612_vm5, %vm613_vm6  ;;  %vm617_vm9 = vcmp.eq.s32.totalorder %v1498_v63, 5  ;;  %vm635_vm13 = vcmp.eq.s32.totalorder %v1496_v62, 0 }
  0x1d   : > { %v133_v26 = vadd.f32 %v132_v22, %v131_v16  ;;  %v160_v27 = vadd.f32 %v159_v23, %v158_v17  ;;  %vm618_vm10 = vmand %vm608_vm3, %vm617_vm9  ;;  %vm636_vm15 = vcmp.eq.s32.totalorder %v1498_v63, 0  ;;  %vm727_vm1 = vcmp.eq.s32.totalorder %v1498_v63, 1 }
  0x1e   : > { %v143_v28 = vrot.slane %v142_v24, 2  ;;  %v151_v29 = vadd.f32 %v150_v25, %v149_v21  ;;  %v619_v4 = vsel %vm618_vm10, 1.0, %v1403_v0  ;;  %vm817_vm4 = vcmp.eq.s32.totalorder %v1498_v63, 2 }
  0x1f   : > { %v134_v30 = vrot.slane %v133_v26, 2  ;;  %v161_v31 = vrot.slane %v160_v27, 2  ;;  %vm906_vm5 = vcmp.eq.s32.totalorder %v1496_v62, 3 }
  0x20   : > { %v144_v32 = vadd.f32 %v143_v28, %v142_v24  ;;  %v152_v33 = vrot.slane %v151_v29, 2 }
  0x21   : > { %v135_v34 = vadd.f32 %v134_v30, %v133_v26  ;;  %v162_v35 = vadd.f32 %v161_v31, %v160_v27 }
  0x22   : > { %v145_v36 = vrot.slane %v144_v32, 1  ;;  %v153_v37 = vadd.f32 %v152_v33, %v151_v29 }
  0x23   : > { %v136_v38 = vrot.slane %v135_v34, 1  ;;  %v163_v39 = vrot.slane %v162_v35, 1 }
  0x24   : > { %v146_v40 = vadd.f32 %v145_v36, %v144_v32  ;;  %v154_v41 = vrot.slane %v153_v37, 1 }
  0x25   : > { %v137_v42 = vadd.f32 %v136_v38, %v135_v34  ;;  %v164_v44 = vadd.f32 %v163_v39, %v162_v35 }
  0x26   : > { %v167_v43 = vmul.f32 0.0625, %v146_v40  ;;  %v155_v46 = vadd.f32 %v154_v41, %v153_v37 }
  0x27   : > { %v166_v45 = vmul.f32 0.0625, %v137_v42  ;;  %v169_v51 = vmul.f32 0.0625, %v164_v44 }
  0x28   : > { %v172_v47 = vsub.f32 %v122_v1, %v167_v43  ;;  %v173_v48 = vsub.f32 %v123_v2, %v167_v43  ;;  %v168_v52 = vmul.f32 0.0625, %v155_v46  ;;  %v611_v1 = vsel %vm610_vm7, 1.0, %v1403_v0 }
  0x29   : > { %v170_v49 = vsub.f32 %v120_v3, %v166_v45  ;;  %v171_v50 = vsub.f32 %v121_v6, %v166_v45  ;;  %v176_v53 = vsub.f32 %v126_v8, %v169_v51  ;;  %v177_v55 = vsub.f32 %v127_v9, %v169_v51 }
  0x2a   : > { %284 = vxpose.xlu1.b32.start [1/2] (short) (narrow) %v172_v47, 8  ;;  %1240 = vmatpush3.msra.mxu1 %v173_v48  ;;  %v174_v54 = vsub.f32 %v124_v14, %v168_v52  ;;  %v175_v56 = vsub.f32 %v125_v15, %v168_v52  ;;  %v615_v2 = vsel %vm614_vm8, -1.0, %v1403_v0  ;;  %vm907_vm7 = vcmp.eq.s32.totalorder %v1498_v63, 3 }
  0x2b   : > { %178 = vxpose.xlu0.b32.start [1/2] (short) (narrow) %v170_v49, 8  ;;  %1233 = vmatpush3.msra.mxu0 %v171_v50  ;;  %v616_v3 = vadd.f32 %v615_v2, %v611_v1  ;;  %vm1124_vm8 = vcmask 1042434  }
  0x2c   : > { %1234 = vmatprep.subr.mxu0 %v1403_v0  ;;  %1241 = vmatprep.subr.mxu1 %v1403_v0 }
  0x2d   : > { %1242 = vmatpush3.msra.mxu1 %v172_v47  ;;  %1235 = vmatpush3.msra.mxu0 %v170_v49  ;;  %v620_v5 = vadd.f32 %v619_v4, %v616_v3 }
  0x2e   : > { %285 = vxpose.xlu1.b32.end [2/2] (short) (narrow) %v173_v48, 8  ;;  %1246 = vmatprep.subr.mxu0 %v1403_v0 }
  0x2f   : > { %179 = vxpose.xlu0.b32.end [2/2] (short) (narrow) %v171_v50, 8  ;;  %1253 = vmatprep.subr.mxu1 %v1403_v0  ;;  %622 = vst.msk [vmem:[#allocation2] sm:$0x3f] %vm621_vm11, %v620_v5  ;;  %623 = vst.msk [vmem:[#allocation2 + $0x8] sm:$0x3f] %vm621_vm11, %v620_v5 }
  0x30   : > { %624 = vst.msk [vmem:[#allocation2 + $0x10] sm:$0x3f] %vm621_vm11, %v620_v5  ;;  %625 = vst.msk [vmem:[#allocation2 + $0x18] sm:$0x3f] %vm621_vm11, %v620_v5 }
  0x32   : > { %494 = vxpose.xlu1.b32.start [1/2] (short) (narrow) %v176_v53, 8 }
  0x33   : > { %389 = vxpose.xlu0.b32.start [1/2] (short) (narrow) %v174_v54, 8 }
  0x36   : > { %495 = vxpose.xlu1.b32.end [2/2] (short) (narrow) %v177_v55, 8 }
  0x37   : > { %390 = vxpose.xlu0.b32.end [2/2] (short) (narrow) %v175_v56, 8 }
  0xa6   : > { %v300_v57 = vpop.trf.xlu1 }
  0xa7   : > { %v194_v58 = vpop.trf.xlu0  ;;  %1244 = vmatmul.mubr.msk.f32.vlgmr.msra.gmra.mxu1 %vm210_vm2, %v300_v57 }
  0xa8   : > { %1237 = vmatmul.mubr.msk.f32.vlgmr.msra.gmra.mxu0 %vm210_vm2, %v194_v58  ;;  %1254 = vmatpush3.msra.mxu1 %v177_v55 }
  0xa9   : > { %1247 = vmatpush3.msra.mxu0 %v175_v56  ;;  %1255 = vmatprep.subr.mxu1 %v1403_v0 }
  0xaa   : > { %1248 = vmatprep.subr.mxu0 %v1403_v0  ;;  %1256 = vmatpush3.msra.mxu1 %v176_v53 }
  0xab   : > { %1249 = vmatpush3.msra.mxu0 %v174_v54  ;;  %1257 = vmatprep.mubr.msk.f32.mxu1 %vm1404_vm0, %v1403_v0 }
  0xac   : > { %1250 = vmatprep.mubr.msk.f32.mxu0 %vm1404_vm0, %v1403_v0  ;;  %vm726_vm0 = vcmp.eq.s32.totalorder %v1496_v62, 1 }
  0xae   : > { %v510_v59 = vpop.trf.xlu1 }
  0xaf   : > { %v405_v60 = vpop.trf.xlu0  ;;  %1258 = vmatmul.mubr.msk.f32.vlgmr.msra.gmra.mxu1 %vm210_vm2, %v510_v59 }
  0xb0   : > { %1251 = vmatmul.mubr.msk.f32.vlgmr.msra.gmra.mxu0 %vm210_vm2, %v405_v60  ;;  %vm816_vm2 = vcmp.eq.s32.totalorder %v1496_v62, 2 }
 0x167   : > { %v385_v6 = vpop.f32.mrf.mxu1 }
 0x168   : > { %v280_v7 = vpop.f32.mrf.mxu0  ;;  %v601_v8 = vmul.f32 0.06666667, %v385_v6 }
 0x169   : > { %v600_v9 = vmul.f32 0.06666667, %v280_v7  ;;  %v1245_v10 = vpop.f32.mrf.mxu1 }
 0x16a   : > { %628 = vst.msk [vmem:[#allocation2 + $0x8] sm:$0xf] %vm626_vm12, %v601_v8  ;;  %v1238_v11 = vpop.f32.mrf.mxu0 }
 0x16b   : > { %627 = vst.msk [vmem:[#allocation2] sm:$0xf] %vm626_vm12, %v600_v9 }
 0x16f   : > { %v595_v0 = vpop.f32.mrf.mxu1 }
 0x170   : > { %v490_v12 = vpop.f32.mrf.mxu0  ;;  %v603_v13 = vmul.f32 0.06666667, %v595_v0 }
 0x171   : > { %v602_v14 = vmul.f32 0.06666667, %v490_v12  ;;  %v1259_v15 = vpop.f32.mrf.mxu1  ;;  %v1523_v16 = vld [vmem:[#allocation2 + $0x8] sm:$0x3f] }
 0x172   : > { %630 = vst.msk [vmem:[#allocation2 + $0x18] sm:$0xf] %vm626_vm12, %v603_v13  ;;  %v1252_v17 = vpop.f32.mrf.mxu0  ;;  %v640_v18 = vsel %vm635_vm13, %v1523_v16, 0.0  ;;  %v1529_v19 = vld [vmem:[#allocation2] sm:$0x3f]  ;;  %v699_v4 = vsel %vm636_vm15, %v1523_v16, 0.0 }
 0x173   : > { %629 = vst.msk [vmem:[#allocation2 + $0x10] sm:$0xf] %vm626_vm12, %v602_v14  ;;  %v650_v20 = vsel %vm621_vm11, %v640_v18, 0.0  ;;  %v639_v21 = vsel %vm635_vm13, %v1529_v19, 0.0  ;;  %v698_v52 = vsel %vm636_vm15, %v1529_v19, 0.0  ;;  %v705_v5 = vsel %vm621_vm11, %v699_v4, 0.0 }
 0x174   : > { %v651_v22 = vrot.slane %v650_v20, 4  ;;  %v643_v23 = vsel %vm621_vm11, %v639_v21, 0.0  ;;  %v702_v56 = vsel %vm621_vm11, %v698_v52, 0.0 }
 0x175   : > { %v644_v24 = vrot.slane %v643_v23, 4 }
 0x176   : > { %v652_v25 = vadd.f32 %v651_v22, %v650_v20 }
 0x177   : > { %v645_v26 = vadd.f32 %v644_v24, %v643_v23 }
 0x178   : > { %v653_v27 = vrot.slane %v652_v25, 2 }
 0x179   : > { %v646_v28 = vrot.slane %v645_v26, 2  ;;  %v1537_v29 = vld [vmem:[#allocation2 + $0x18] sm:$0x3f] }
 0x17a   : > { %v654_v30 = vadd.f32 %v653_v27, %v652_v25  ;;  %v1539_v31 = vld [vmem:[#allocation2 + $0x10] sm:$0x3f]  ;;  %v642_v32 = vsel %vm635_vm13, %v1537_v29, 0.0  ;;  %v701_v6 = vsel %vm636_vm15, %v1537_v29, 0.0 }
 0x17b   : > { %v647_v33 = vadd.f32 %v646_v28, %v645_v26  ;;  %v641_v34 = vsel %vm635_vm13, %v1539_v31, 0.0  ;;  %v664_v35 = vsel %vm621_vm11, %v642_v32, 0.0  ;;  %v700_v57 = vsel %vm636_vm15, %v1539_v31, 0.0 }
 0x17c   : > { %v655_v36 = vrot.slane %v654_v30, 1  ;;  %v657_v37 = vsel %vm621_vm11, %v641_v34, 0.0  ;;  %v665_v38 = vrot.slane %v664_v35, 4  ;;  %v708_v61 = vsel %vm621_vm11, %v700_v57, 0.0 }
 0x17d   : > { %v648_v39 = vrot.slane %v647_v33, 1  ;;  %v658_v40 = vrot.slane %v657_v37, 4  ;;  %v711_v7 = vsel %vm621_vm11, %v701_v6, 0.0 }
 0x17e   : > { %v656_v41 = vadd.f32 %v655_v36, %v654_v30  ;;  %v666_v42 = vadd.f32 %v665_v38, %v664_v35 }
 0x17f   : > { %v649_v43 = vadd.f32 %v648_v39, %v647_v33  ;;  %v659_v44 = vadd.f32 %v658_v40, %v657_v37 }
 0x180   : > { %v674_v45 = vsel %vm636_vm15, %v656_v41, 0.0  ;;  %v667_v46 = vrot.slane %v666_v42, 2 }
 0x181   : > { %v681_v47 = vsel %vm677_vm14, %v674_v45, 0.0  ;;  %v673_v48 = vsel %vm636_vm15, %v649_v43, 0.0  ;;  %v660_v49 = vrot.slane %v659_v44, 2 }
 0x182   : > { %682 = vadd.xlane.f32.xlu1 %v681_v47  ;;  %v678_v50 = vsel %vm677_vm14, %v673_v48, 0.0  ;;  %v668_v51 = vadd.f32 %v667_v46, %v666_v42 }
 0x183   : > { %679 = vadd.xlane.f32.xlu0 %v678_v50  ;;  %v661_v53 = vadd.f32 %v660_v49, %v659_v44 }
 0x184   : > { %v669_v54 = vrot.slane %v668_v51, 1 }
 0x185   : > { %v662_v55 = vrot.slane %v661_v53, 1 }
 0x186   : > { %v670_v59 = vadd.f32 %v669_v54, %v668_v51 }
 0x187   : > { %703 = vadd.xlane.f32.xlu0 %v702_v56  ;;  %v663_v58 = vadd.f32 %v662_v55, %v661_v53 }
 0x188   : > { %v676_v2 = vsel %vm636_vm15, %v670_v59, 0.0 }
 0x189   : > { %v675_v60 = vsel %vm636_vm15, %v663_v58, 0.0  ;;  %v687_v3 = vsel %vm677_vm14, %v676_v2, 0.0 }
 0x18a   : > { %v684_v1 = vsel %vm677_vm14, %v675_v60, 0.0 }
 0x18b   : > { %709 = vadd.xlane.f32.xlu0 %v708_v61  ;;  %685 = vadd.xlane.f32.xlu1 %v684_v1 }
 0x18f   : > { %688 = vadd.xlane.f32.xlu1 %v687_v3 }
 0x193   : > { %706 = vadd.xlane.f32.xlu1 %v705_v5 }
 0x197   : > { %712 = vadd.xlane.f32.xlu1 %v711_v7 }
 0x20b   : > { %v683_v8 = vpop.xlane.xlu1 %682 }
 0x20c   : > { %1301 = vrcp.f32 %v683_v8  ;;  %v680_v9 = vpop.xlane.xlu0 %679 }
 0x20d   : > { %1303 = vrcp.f32 %v680_v9 }
 0x210   : > { %v704_v15 = vpop.xlane.xlu0 %703 }
 0x214   : > { %v686_v10 = vpop.xlane.xlu1 %685  ;;  %v710_v30 = vpop.xlane.xlu0 %709 }
 0x215   : > { %1305 = vrcp.f32 %v686_v10 }
 0x218   : > { %v689_v11 = vpop.xlane.xlu1 %688 }
 0x219   : > { %v1302_v0 = vpop.eup %1301  ;;  %1307 = vrcp.f32 %v689_v11 }
 0x21a   : > { %v1304_v12 = vpop.eup %1303  ;;  %v695_v13 = vmul.f32 %v1302_v0, %v656_v41 }
 0x21b   : > { %v694_v14 = vmul.f32 %v1304_v12, %v649_v43 }
 0x21c   : > { %v707_v17 = vpop.xlane.xlu1 %706 }
 0x21d   : > { %v714_v18 = vmul.f32 %v704_v15, %v694_v14  ;;  %v715_v20 = vmul.f32 %v707_v17, %v695_v13 }
 0x21f   : > { %v718_v21 = vsub.f32 %v1529_v19, %v714_v18  ;;  %v719_v22 = vsub.f32 %v1523_v16, %v715_v20 }
 0x220   : > { %v713_v40 = vpop.xlane.xlu1 %712 }
 0x221   : > { %v1583_v23 = vsel %vm635_vm13, %v694_v14, %v718_v21  ;;  %v1587_v24 = vsel %vm635_vm13, %v695_v13, %v719_v22 }
 0x222   : > { %v1306_v25 = vpop.eup %1305  ;;  %v730_v26 = vsel %vm726_vm0, %v1583_v23, 0.0  ;;  %v731_v27 = vsel %vm726_vm0, %v1587_v24, 0.0  ;;  %v788_v11 = vsel %vm727_vm1, %v1583_v23, 0.0  ;;  %v789_v17 = vsel %vm727_vm1, %v1587_v24, 0.0 }
 0x223   : > { %v696_v19 = vmul.f32 %v1306_v25, %v663_v58  ;;  %v734_v16 = vsel %vm621_vm11, %v730_v26, 0.0  ;;  %v741_v28 = vsel %vm621_vm11, %v731_v27, 0.0  ;;  %v792_v13 = vsel %vm621_vm11, %v788_v11, 0.0 }
 0x224   : > { %v735_v32 = vrot.slane %v734_v16, 4  ;;  %v742_v33 = vrot.slane %v741_v28, 4  ;;  %v795_v20 = vsel %vm621_vm11, %v789_v17, 0.0 }
 0x225   : > { %v716_v34 = vmul.f32 %v710_v30, %v696_v19 }
 0x226   : > { %v1308_v35 = vpop.eup %1307  ;;  %v736_v36 = vadd.f32 %v735_v32, %v734_v16  ;;  %v743_v37 = vadd.f32 %v742_v33, %v741_v28 }
 0x227   : > { %v697_v38 = vmul.f32 %v1308_v35, %v670_v59  ;;  %v720_v39 = vsub.f32 %v1539_v31, %v716_v34 }
 0x228   : > { %v737_v41 = vrot.slane %v736_v36, 2  ;;  %v744_v42 = vrot.slane %v743_v37, 2 }
 0x229   : > { %v717_v43 = vmul.f32 %v713_v40, %v697_v38  ;;  %v1600_v44 = vsel %vm635_vm13, %v696_v19, %v720_v39 }
 0x22a   : > { %v738_v45 = vadd.f32 %v737_v41, %v736_v36  ;;  %v745_v46 = vadd.f32 %v744_v42, %v743_v37  ;;  %v732_v47 = vsel %vm726_vm0, %v1600_v44, 0.0  ;;  %v790_v15 = vsel %vm727_vm1, %v1600_v44, 0.0 }
 0x22b   : > { %v721_v48 = vsub.f32 %v1537_v29, %v717_v43  ;;  %v748_v49 = vsel %vm621_vm11, %v732_v47, 0.0  ;;  %v798_v18 = vsel %vm621_vm11, %v790_v15, 0.0 }
 0x22c   : > { %v739_v50 = vrot.slane %v738_v45, 1  ;;  %v746_v31 = vrot.slane %v745_v46, 1  ;;  %v749_v51 = vrot.slane %v748_v49, 4 }
 0x22d   : > { %v1609_v52 = vsel %vm635_vm13, %v697_v38, %v721_v48 }
 0x22e   : > { %v733_v53 = vsel %vm726_vm0, %v1609_v52, 0.0  ;;  %v740_v54 = vadd.f32 %v739_v50, %v738_v45  ;;  %v747_v55 = vadd.f32 %v746_v31, %v745_v46  ;;  %v750_v56 = vadd.f32 %v749_v51, %v748_v49 }
 0x22f   : > { %v755_v29 = vsel %vm621_vm11, %v733_v53, 0.0  ;;  %v791_v21 = vsel %vm727_vm1, %v1609_v52, 0.0 }
 0x230   : > { %v764_v57 = vsel %vm727_vm1, %v740_v54, 0.0  ;;  %v765_v58 = vsel %vm727_vm1, %v747_v55, 0.0  ;;  %v751_v59 = vrot.slane %v750_v56, 2  ;;  %v756_v60 = vrot.slane %v755_v29, 4 }
 0x231   : > { %v768_v61 = vsel %vm677_vm14, %v764_v57, 0.0  ;;  %v771_v1 = vsel %vm677_vm14, %v765_v58, 0.0  ;;  %v801_v22 = vsel %vm621_vm11, %v791_v21, 0.0 }
 0x232   : > { %769 = vadd.xlane.f32.xlu0 %v768_v61  ;;  %772 = vadd.xlane.f32.xlu1 %v771_v1  ;;  %v752_v2 = vadd.f32 %v751_v59, %v750_v56  ;;  %v757_v3 = vadd.f32 %v756_v60, %v755_v29 }
 0x234   : > { %v753_v4 = vrot.slane %v752_v2, 1  ;;  %v758_v5 = vrot.slane %v757_v3, 2 }
 0x236   : > { %v754_v6 = vadd.f32 %v753_v4, %v752_v2  ;;  %v759_v7 = vadd.f32 %v758_v5, %v757_v3 }
 0x238   : > { %v766_v8 = vsel %vm727_vm1, %v754_v6, 0.0  ;;  %v760_v9 = vrot.slane %v759_v7, 1 }
 0x239   : > { %v774_v10 = vsel %vm677_vm14, %v766_v8, 0.0 }
 0x23a   : > { %775 = vadd.xlane.f32.xlu0 %v774_v10  ;;  %v761_v0 = vadd.f32 %v760_v9, %v759_v7 }
 0x23c   : > { %v767_v12 = vsel %vm727_vm1, %v761_v0, 0.0 }
 0x23d   : > { %v777_v14 = vsel %vm677_vm14, %v767_v12, 0.0 }
 0x23e   : > { %793 = vadd.xlane.f32.xlu0 %v792_v13  ;;  %778 = vadd.xlane.f32.xlu1 %v777_v14 }
 0x242   : > { %799 = vadd.xlane.f32.xlu0 %v798_v18  ;;  %796 = vadd.xlane.f32.xlu1 %v795_v20 }
 0x246   : > { %802 = vadd.xlane.f32.xlu1 %v801_v22 }
 0x2bb   : > { %v770_v25 = vpop.xlane.xlu0 %769  ;;  %v773_v26 = vpop.xlane.xlu1 %772 }
 0x2bc   : > { %1309 = vrcp.f32 %v770_v25 }
 0x2bd   : > { %1311 = vrcp.f32 %v773_v26 }
 0x2c3   : > { %v776_v27 = vpop.xlane.xlu0 %775 }
 0x2c4   : > { %1313 = vrcp.f32 %v776_v27 }
 0x2c7   : > { %v779_v19 = vpop.xlane.xlu1 %778  ;;  %v794_v32 = vpop.xlane.xlu0 %793 }
 0x2c8   : > { %1315 = vrcp.f32 %v779_v19 }
 0x2c9   : > { %v1310_v16 = vpop.eup %1309 }
 0x2ca   : > { %v1312_v28 = vpop.eup %1311  ;;  %v784_v30 = vmul.f32 %v1310_v16, %v740_v54 }
 0x2cb   : > { %v785_v33 = vmul.f32 %v1312_v28, %v747_v55  ;;  %v797_v34 = vpop.xlane.xlu1 %796  ;;  %v800_v45 = vpop.xlane.xlu0 %799 }
 0x2cc   : > { %v804_v35 = vmul.f32 %v794_v32, %v784_v30 }
 0x2cd   : > { %v805_v36 = vmul.f32 %v797_v34, %v785_v33 }
 0x2ce   : > { %v808_v37 = vsub.f32 %v1583_v23, %v804_v35 }
 0x2cf   : > { %v809_v38 = vsub.f32 %v1587_v24, %v805_v36  ;;  %v803_v55 = vpop.xlane.xlu1 %802 }
 0x2d0   : > { %v1649_v39 = vsel %vm726_vm0, %v784_v30, %v808_v37 }
 0x2d1   : > { %v1314_v40 = vpop.eup %1313  ;;  %v820_v41 = vsel %vm816_vm2, %v1649_v39, 0.0  ;;  %v1656_v42 = vsel %vm726_vm0, %v785_v33, %v809_v38  ;;  %v878_v19 = vsel %vm817_vm4, %v1649_v39, 0.0 }
 0x2d2   : > { %v786_v43 = vmul.f32 %v1314_v40, %v754_v6  ;;  %v821_v23 = vsel %vm816_vm2, %v1656_v42, 0.0  ;;  %v824_v24 = vsel %vm621_vm11, %v820_v41, 0.0  ;;  %v882_v30 = vsel %vm621_vm11, %v878_v19, 0.0 }
 0x2d3   : > { %v825_v46 = vrot.slane %v824_v24, 4  ;;  %v831_v47 = vsel %vm621_vm11, %v821_v23, 0.0  ;;  %v879_v34 = vsel %vm817_vm4, %v1656_v42, 0.0 }
 0x2d4   : > { %v806_v48 = vmul.f32 %v800_v45, %v786_v43  ;;  %v832_v49 = vrot.slane %v831_v47, 4  ;;  %v885_v36 = vsel %vm621_vm11, %v879_v34, 0.0 }
 0x2d5   : > { %v1316_v50 = vpop.eup %1315  ;;  %v826_v31 = vadd.f32 %v825_v46, %v824_v24 }
 0x2d6   : > { %v810_v51 = vsub.f32 %v1600_v44, %v806_v48  ;;  %v787_v53 = vmul.f32 %v1316_v50, %v761_v0  ;;  %v833_v54 = vadd.f32 %v832_v49, %v831_v47 }
 0x2d7   : > { %v827_v56 = vrot.slane %v826_v31, 2 }
 0x2d8   : > { %v1666_v29 = vsel %vm726_vm0, %v786_v43, %v810_v51  ;;  %v807_v57 = vmul.f32 %v803_v55, %v787_v53  ;;  %v834_v58 = vrot.slane %v833_v54, 2 }
 0x2d9   : > { %v822_v59 = vsel %vm816_vm2, %v1666_v29, 0.0  ;;  %v828_v60 = vadd.f32 %v827_v56, %v826_v31  ;;  %v880_v33 = vsel %vm817_vm4, %v1666_v29, 0.0 }
 0x2da   : > { %v811_v61 = vsub.f32 %v1609_v52, %v807_v57  ;;  %v835_v1 = vadd.f32 %v834_v58, %v833_v54  ;;  %v838_v44 = vsel %vm621_vm11, %v822_v59, 0.0  ;;  %v888_v35 = vsel %vm621_vm11, %v880_v33, 0.0 }
 0x2db   : > { %v829_v2 = vrot.slane %v828_v60, 1  ;;  %v839_v3 = vrot.slane %v838_v44, 4 }
 0x2dc   : > { %v1675_v4 = vsel %vm726_vm0, %v787_v53, %v811_v61  ;;  %v836_v5 = vrot.slane %v835_v1, 1 }
 0x2dd   : > { %v823_v6 = vsel %vm816_vm2, %v1675_v4, 0.0  ;;  %v830_v7 = vadd.f32 %v829_v2, %v828_v60  ;;  %v840_v8 = vadd.f32 %v839_v3, %v838_v44  ;;  %v881_v37 = vsel %vm817_vm4, %v1675_v4, 0.0 }
 0x2de   : > { %v837_v9 = vadd.f32 %v836_v5, %v835_v1  ;;  %v845_v52 = vsel %vm621_vm11, %v823_v6, 0.0  ;;  %v891_v38 = vsel %vm621_vm11, %v881_v37, 0.0 }
 0x2df   : > { %v854_v10 = vsel %vm817_vm4, %v830_v7, 0.0  ;;  %v841_v11 = vrot.slane %v840_v8, 2  ;;  %v846_v0 = vrot.slane %v845_v52, 4 }
 0x2e0   : > { %v858_v12 = vsel %vm677_vm14, %v854_v10, 0.0  ;;  %v855_v13 = vsel %vm817_vm4, %v837_v9, 0.0 }
 0x2e1   : > { %859 = vadd.xlane.f32.xlu0 %v858_v12  ;;  %v861_v14 = vsel %vm677_vm14, %v855_v13, 0.0  ;;  %v842_v15 = vadd.f32 %v841_v11, %v840_v8  ;;  %v847_v17 = vadd.f32 %v846_v0, %v845_v52 }
 0x2e2   : > { %862 = vadd.xlane.f32.xlu1 %v861_v14 }
 0x2e3   : > { %v843_v18 = vrot.slane %v842_v15, 1  ;;  %v848_v20 = vrot.slane %v847_v17, 2 }
 0x2e5   : > { %v844_v21 = vadd.f32 %v843_v18, %v842_v15  ;;  %v849_v22 = vadd.f32 %v848_v20, %v847_v17 }
 0x2e7   : > { %v856_v25 = vsel %vm817_vm4, %v844_v21, 0.0  ;;  %v850_v26 = vrot.slane %v849_v22, 1 }
 0x2e8   : > { %v864_v27 = vsel %vm677_vm14, %v856_v25, 0.0 }
 0x2e9   : > { %865 = vadd.xlane.f32.xlu0 %v864_v27  ;;  %v851_v16 = vadd.f32 %v850_v26, %v849_v22 }
 0x2eb   : > { %v857_v28 = vsel %vm817_vm4, %v851_v16, 0.0 }
 0x2ec   : > { %v867_v32 = vsel %vm677_vm14, %v857_v28, 0.0 }
 0x2ed   : > { %883 = vadd.xlane.f32.xlu0 %v882_v30  ;;  %868 = vadd.xlane.f32.xlu1 %v867_v32 }
 0x2f1   : > { %889 = vadd.xlane.f32.xlu0 %v888_v35  ;;  %886 = vadd.xlane.f32.xlu1 %v885_v36 }
 0x2f5   : > { %892 = vadd.xlane.f32.xlu1 %v891_v38 }
 0x36a   : > { %v860_v40 = vpop.xlane.xlu0 %859 }
 0x36b   : > { %1317 = vrcp.f32 %v860_v40  ;;  %v863_v41 = vpop.xlane.xlu1 %862 }
 0x36c   : > { %1319 = vrcp.f32 %v863_v41 }
 0x372   : > { %v866_v43 = vpop.xlane.xlu0 %865 }
 0x373   : > { %1321 = vrcp.f32 %v866_v43 }
 0x376   : > { %v869_v23 = vpop.xlane.xlu1 %868  ;;  %v884_v47 = vpop.xlane.xlu0 %883 }
 0x377   : > { %1323 = vrcp.f32 %v869_v23 }
 0x378   : > { %v1318_v24 = vpop.eup %1317 }
 0x379   : > { %v1320_v45 = vpop.eup %1319  ;;  %v874_v46 = vmul.f32 %v1318_v24, %v830_v7 }
 0x37a   : > { %v875_v48 = vmul.f32 %v1320_v45, %v837_v9  ;;  %v887_v49 = vpop.xlane.xlu1 %886  ;;  %v890_v59 = vpop.xlane.xlu0 %889 }
 0x37b   : > { %v894_v50 = vmul.f32 %v884_v47, %v874_v46 }
 0x37c   : > { %v895_v31 = vmul.f32 %v887_v49, %v875_v48 }
 0x37d   : > { %v898_v51 = vsub.f32 %v1649_v39, %v894_v50 }
 0x37e   : > { %v899_v53 = vsub.f32 %v1656_v42, %v895_v31  ;;  %v893_v8 = vpop.xlane.xlu1 %892 }
 0x37f   : > { %v1715_v54 = vsel %vm816_vm2, %v874_v46, %v898_v51 }
 0x380   : > { %v1322_v55 = vpop.eup %1321  ;;  %v910_v56 = vsel %vm906_vm5, %v1715_v54, 0.0  ;;  %v1722_v57 = vsel %vm816_vm2, %v875_v48, %v899_v53  ;;  %v968_v23 = vsel %vm907_vm7, %v1715_v54, 0.0 }
 0x381   : > { %v876_v58 = vmul.f32 %v1322_v55, %v844_v21  ;;  %v911_v39 = vsel %vm906_vm5, %v1722_v57, 0.0  ;;  %v914_v42 = vsel %vm621_vm11, %v910_v56, 0.0  ;;  %v972_v46 = vsel %vm621_vm11, %v968_v23, 0.0 }
 0x382   : > { %v915_v60 = vrot.slane %v914_v42, 4  ;;  %v921_v61 = vsel %vm621_vm11, %v911_v39, 0.0  ;;  %v969_v49 = vsel %vm907_vm7, %v1722_v57, 0.0 }
 0x383   : > { %v896_v1 = vmul.f32 %v890_v59, %v876_v58  ;;  %v922_v44 = vrot.slane %v921_v61, 4  ;;  %v975_v31 = vsel %vm621_vm11, %v969_v49, 0.0 }
 0x384   : > { %v1324_v2 = vpop.eup %1323  ;;  %v916_v3 = vadd.f32 %v915_v60, %v914_v42 }
 0x385   : > { %v900_v5 = vsub.f32 %v1666_v29, %v896_v1  ;;  %v877_v6 = vmul.f32 %v1324_v2, %v851_v16  ;;  %v923_v7 = vadd.f32 %v922_v44, %v921_v61 }
 0x386   : > { %v917_v9 = vrot.slane %v916_v3, 2 }
 0x387   : > { %v1732_v52 = vsel %vm816_vm2, %v876_v58, %v900_v5  ;;  %v897_v10 = vmul.f32 %v893_v8, %v877_v6  ;;  %v924_v11 = vrot.slane %v923_v7, 2 }
 0x388   : > { %v912_v0 = vsel %vm906_vm5, %v1732_v52, 0.0  ;;  %v918_v12 = vadd.f32 %v917_v9, %v916_v3  ;;  %v970_v48 = vsel %vm907_vm7, %v1732_v52, 0.0 }
 0x389   : > { %v901_v13 = vsub.f32 %v1675_v4, %v897_v10  ;;  %v925_v14 = vadd.f32 %v924_v11, %v923_v7  ;;  %v928_v29 = vsel %vm621_vm11, %v912_v0, 0.0  ;;  %v978_v50 = vsel %vm621_vm11, %v970_v48, 0.0 }
 0x38a   : > { %v919_v15 = vrot.slane %v918_v12, 1  ;;  %v929_v17 = vrot.slane %v928_v29, 4 }
 0x38b   : > { %v1741_v18 = vsel %vm816_vm2, %v877_v6, %v901_v13  ;;  %v926_v20 = vrot.slane %v925_v14, 1 }
 0x38c   : > { %v913_v21 = vsel %vm906_vm5, %v1741_v18, 0.0  ;;  %v920_v22 = vadd.f32 %v919_v15, %v918_v12  ;;  %v930_v25 = vadd.f32 %v929_v17, %v928_v29  ;;  %v971_v51 = vsel %vm907_vm7, %v1741_v18, 0.0 }
 0x38d   : > { %v927_v26 = vadd.f32 %v926_v20, %v925_v14  ;;  %v935_v4 = vsel %vm621_vm11, %v913_v21, 0.0  ;;  %v981_v53 = vsel %vm621_vm11, %v971_v51, 0.0 }
 0x38e   : > { %v944_v27 = vsel %vm907_vm7, %v920_v22, 0.0  ;;  %v931_v19 = vrot.slane %v930_v25, 2  ;;  %v936_v16 = vrot.slane %v935_v4, 4 }
 0x38f   : > { %v948_v28 = vsel %vm677_vm14, %v944_v27, 0.0  ;;  %v945_v30 = vsel %vm907_vm7, %v927_v26, 0.0 }
 0x390   : > { %949 = vadd.xlane.f32.xlu0 %v948_v28  ;;  %v951_v32 = vsel %vm677_vm14, %v945_v30, 0.0  ;;  %v932_v33 = vadd.f32 %v931_v19, %v930_v25  ;;  %v937_v34 = vadd.f32 %v936_v16, %v935_v4 }
 0x391   : > { %952 = vadd.xlane.f32.xlu1 %v951_v32 }
 0x392   : > { %v933_v35 = vrot.slane %v932_v33, 1  ;;  %v938_v36 = vrot.slane %v937_v34, 2 }
 0x394   : > { %v934_v37 = vadd.f32 %v933_v35, %v932_v33  ;;  %v939_v38 = vadd.f32 %v938_v36, %v937_v34 }
 0x396   : > { %v946_v40 = vsel %vm907_vm7, %v934_v37, 0.0  ;;  %v940_v41 = vrot.slane %v939_v38, 1 }
 0x397   : > { %v954_v43 = vsel %vm677_vm14, %v946_v40, 0.0 }
 0x398   : > { %955 = vadd.xlane.f32.xlu0 %v954_v43  ;;  %v941_v24 = vadd.f32 %v940_v41, %v939_v38 }
 0x39a   : > { %v947_v45 = vsel %vm907_vm7, %v941_v24, 0.0 }
 0x39b   : > { %v957_v47 = vsel %vm677_vm14, %v947_v45, 0.0 }
 0x39c   : > { %973 = vadd.xlane.f32.xlu0 %v972_v46  ;;  %958 = vadd.xlane.f32.xlu1 %v957_v47 }
 0x3a0   : > { %979 = vadd.xlane.f32.xlu0 %v978_v50  ;;  %976 = vadd.xlane.f32.xlu1 %v975_v31 }
 0x3a4   : > { %982 = vadd.xlane.f32.xlu1 %v981_v53 }
 0x419   : > { %v950_v55 = vpop.xlane.xlu0 %949 }
 0x41a   : > { %1325 = vrcp.f32 %v950_v55  ;;  %v953_v56 = vpop.xlane.xlu1 %952 }
 0x41b   : > { %1327 = vrcp.f32 %v953_v56 }
 0x421   : > { %v956_v58 = vpop.xlane.xlu0 %955 }
 0x422   : > { %1329 = vrcp.f32 %v956_v58 }
 0x425   : > { %v959_v39 = vpop.xlane.xlu1 %958  ;;  %v974_v61 = vpop.xlane.xlu0 %973 }
 0x426   : > { %1331 = vrcp.f32 %v959_v39 }
 0x427   : > { %v1326_v42 = vpop.eup %1325 }
 0x428   : > { %v1328_v59 = vpop.eup %1327  ;;  %v964_v60 = vmul.f32 %v1326_v42, %v920_v22 }
 0x429   : > { %v965_v1 = vmul.f32 %v1328_v59, %v927_v26  ;;  %v977_v44 = vpop.xlane.xlu1 %976  ;;  %v980_v0 = vpop.xlane.xlu0 %979 }
 0x42a   : > { %v984_v2 = vmul.f32 %v974_v61, %v964_v60 }
 0x42b   : > { %v985_v3 = vmul.f32 %v977_v44, %v965_v1 }
 0x42c   : > { %v988_v5 = vsub.f32 %v1715_v54, %v984_v2 }
 0x42d   : > { %v989_v6 = vsub.f32 %v1722_v57, %v985_v3  ;;  %v983_v25 = vpop.xlane.xlu1 %982 }
 0x42e   : > { %v1780_v7 = vsel %vm906_vm5, %v964_v60, %v988_v5 }
 0x42f   : > { %v1330_v8 = vpop.eup %1329  ;;  %v998_v9 = vsel %vm608_vm3, %v1780_v7, 0.0  ;;  %v1787_v10 = vsel %vm906_vm5, %v965_v1, %v989_v6  ;;  %v1056_v39 = vsel %vm613_vm6, %v1780_v7, 0.0 }
 0x430   : > { %v966_v11 = vmul.f32 %v1330_v8, %v934_v37  ;;  %v999_v54 = vsel %vm608_vm3, %v1787_v10, 0.0  ;;  %v1002_v57 = vsel %vm621_vm11, %v998_v9, 0.0  ;;  %v1060_v60 = vsel %vm621_vm11, %v1056_v39, 0.0 }
 0x431   : > { %v1003_v12 = vrot.slane %v1002_v57, 4  ;;  %v1009_v13 = vsel %vm621_vm11, %v999_v54, 0.0  ;;  %v1057_v44 = vsel %vm613_vm6, %v1787_v10, 0.0 }
 0x432   : > { %v986_v14 = vmul.f32 %v980_v0, %v966_v11  ;;  %v1010_v29 = vrot.slane %v1009_v13, 4  ;;  %v1063_v3 = vsel %vm621_vm11, %v1057_v44, 0.0 }
 0x433   : > { %v1332_v15 = vpop.eup %1331  ;;  %v1004_v17 = vadd.f32 %v1003_v12, %v1002_v57 }
 0x434   : > { %v990_v20 = vsub.f32 %v1732_v52, %v986_v14  ;;  %v967_v21 = vmul.f32 %v1332_v15, %v941_v24  ;;  %v1011_v22 = vadd.f32 %v1010_v29, %v1009_v13 }
 0x435   : > { %v1005_v26 = vrot.slane %v1004_v17, 2 }
 0x436   : > { %v1797_v4 = vsel %vm906_vm5, %v966_v11, %v990_v20  ;;  %v987_v27 = vmul.f32 %v983_v25, %v967_v21  ;;  %v1012_v19 = vrot.slane %v1011_v22, 2 }
 0x437   : > { %v1000_v16 = vsel %vm608_vm3, %v1797_v4, 0.0  ;;  %v1006_v28 = vadd.f32 %v1005_v26, %v1004_v17  ;;  %v1058_v1 = vsel %vm613_vm6, %v1797_v4, 0.0 }
 0x438   : > { %v991_v30 = vsub.f32 %v1741_v18, %v987_v27  ;;  %v1013_v32 = vadd.f32 %v1012_v19, %v1011_v22  ;;  %v1016_v52 = vsel %vm621_vm11, %v1000_v16, 0.0  ;;  %v1066_v2 = vsel %vm621_vm11, %v1058_v1, 0.0 }
 0x439   : > { %v1007_v33 = vrot.slane %v1006_v28, 1  ;;  %v1017_v34 = vrot.slane %v1016_v52, 4 }
 0x43a   : > { %v1806_v35 = vsel %vm906_vm5, %v967_v21, %v991_v30  ;;  %v1014_v36 = vrot.slane %v1013_v32, 1 }
 0x43b   : > { %v1001_v37 = vsel %vm608_vm3, %v1806_v35, 0.0  ;;  %v1008_v38 = vadd.f32 %v1007_v33, %v1006_v28  ;;  %v1018_v40 = vadd.f32 %v1017_v34, %v1016_v52  ;;  %v1059_v5 = vsel %vm613_vm6, %v1806_v35, 0.0 }
 0x43c   : > { %v1015_v41 = vadd.f32 %v1014_v36, %v1013_v32  ;;  %v1023_v43 = vsel %vm621_vm11, %v1001_v37, 0.0  ;;  %v1069_v6 = vsel %vm621_vm11, %v1059_v5, 0.0 }
 0x43d   : > { %v1032_v18 = vsel %vm613_vm6, %v1008_v38, 0.0  ;;  %v1019_v23 = vrot.slane %v1018_v40, 2  ;;  %v1024_v24 = vrot.slane %v1023_v43, 4 }
 0x43e   : > { %v1036_v45 = vsel %vm677_vm14, %v1032_v18, 0.0  ;;  %v1033_v46 = vsel %vm613_vm6, %v1015_v41, 0.0 }
 0x43f   : > { %1037 = vadd.xlane.f32.xlu0 %v1036_v45  ;;  %v1039_v47 = vsel %vm677_vm14, %v1033_v46, 0.0  ;;  %v1020_v48 = vadd.f32 %v1019_v23, %v1018_v40  ;;  %v1025_v49 = vadd.f32 %v1024_v24, %v1023_v43  ;;  %v1108_v24 = vsub.s32 %v1498_v63, %v1496_v62 }
 0x440   : > { %1040 = vadd.xlane.f32.xlu1 %v1039_v47 }
 0x441   : > { %v1021_v50 = vrot.slane %v1020_v48, 1  ;;  %v1026_v31 = vrot.slane %v1025_v49, 2 }
 0x443   : > { %v1022_v51 = vadd.f32 %v1021_v50, %v1020_v48  ;;  %v1027_v53 = vadd.f32 %v1026_v31, %v1025_v49 }
 0x445   : > { %v1034_v55 = vsel %vm613_vm6, %v1022_v51, 0.0  ;;  %v1028_v56 = vrot.slane %v1027_v53, 1 }
 0x446   : > { %v1042_v58 = vsel %vm677_vm14, %v1034_v55, 0.0 }
 0x447   : > { %1043 = vadd.xlane.f32.xlu0 %v1042_v58  ;;  %v1029_v42 = vadd.f32 %v1028_v56, %v1027_v53 }
 0x449   : > { %v1035_v59 = vsel %vm613_vm6, %v1029_v42, 0.0  ;;  %vm1122_vm6 = vcmask 1041409  }
 0x44a   : > { %v1045_v61 = vsel %vm677_vm14, %v1035_v59, 0.0 }
 0x44b   : > { %1061 = vadd.xlane.f32.xlu0 %v1060_v60  ;;  %1046 = vadd.xlane.f32.xlu1 %v1045_v61 }
 0x44f   : > { %1067 = vadd.xlane.f32.xlu0 %v1066_v2  ;;  %1064 = vadd.xlane.f32.xlu1 %v1063_v3 }
 0x453   : > { %1070 = vadd.xlane.f32.xlu1 %v1069_v6 }
 0x4c8   : > { %v1038_v8 = vpop.xlane.xlu0 %1037 }
 0x4c9   : > { %1333 = vrcp.f32 %v1038_v8  ;;  %v1041_v9 = vpop.xlane.xlu1 %1040 }
 0x4ca   : > { %1335 = vrcp.f32 %v1041_v9 }
 0x4d0   : > { %v1044_v11 = vpop.xlane.xlu0 %1043 }
 0x4d1   : > { %1337 = vrcp.f32 %v1044_v11 }
 0x4d4   : > { %v1047_v54 = vpop.xlane.xlu1 %1046  ;;  %v1062_v13 = vpop.xlane.xlu0 %1061 }
 0x4d5   : > { %1339 = vrcp.f32 %v1047_v54 }
 0x4d6   : > { %v1334_v57 = vpop.eup %1333 }
 0x4d7   : > { %v1336_v0 = vpop.eup %1335  ;;  %v1052_v12 = vmul.f32 %v1334_v57, %v1008_v38 }
 0x4d8   : > { %v1053_v14 = vmul.f32 %v1336_v0, %v1015_v41  ;;  %v1065_v29 = vpop.xlane.xlu1 %1064  ;;  %v1068_v30 = vpop.xlane.xlu0 %1067 }
 0x4d9   : > { %v1072_v15 = vmul.f32 %v1062_v13, %v1052_v12 }
 0x4da   : > { %v1073_v17 = vmul.f32 %v1065_v29, %v1053_v14 }
 0x4db   : > { %v1076_v20 = vsub.f32 %v1780_v7, %v1072_v15 }
 0x4dc   : > { %v1077_v21 = vsub.f32 %v1787_v10, %v1073_v17  ;;  %v1071_v34 = vpop.xlane.xlu1 %1070 }
 0x4dd   : > { %v1080_v22 = vsel %vm608_vm3, %v1052_v12, %v1076_v20 }
 0x4de   : > { %v1338_v25 = vpop.eup %1337  ;;  %v1086_v26 = vsel %vm617_vm9, %v1080_v22, 0.0  ;;  %v1081_v27 = vsel %vm608_vm3, %v1053_v14, %v1077_v21 }
 0x4df   : > { %v1054_v19 = vmul.f32 %v1338_v25, %v1022_v51  ;;  %v1090_v16 = vsel %vm621_vm11, %v1086_v26, 0.0  ;;  %v1087_v28 = vsel %vm617_vm9, %v1081_v27, 0.0 }
 0x4e0   : > { %1091 = vadd.xlane.f32.xlu0 %v1090_v16  ;;  %v1093_v7 = vsel %vm621_vm11, %v1087_v28, 0.0 }
 0x4e1   : > { %v1074_v10 = vmul.f32 %v1068_v30, %v1054_v19  ;;  %1094 = vadd.xlane.f32.xlu1 %v1093_v7 }
 0x4e2   : > { %v1340_v32 = vpop.eup %1339 }
 0x4e3   : > { %v1078_v52 = vsub.f32 %v1797_v4, %v1074_v10  ;;  %v1055_v33 = vmul.f32 %v1340_v32, %v1029_v42 }
 0x4e5   : > { %v1075_v36 = vmul.f32 %v1071_v34, %v1055_v33  ;;  %v1082_v37 = vsel %vm608_vm3, %v1054_v19, %v1078_v52 }
 0x4e6   : > { %v1088_v38 = vsel %vm617_vm9, %v1082_v37, 0.0 }
 0x4e7   : > { %v1079_v40 = vsub.f32 %v1806_v35, %v1075_v36  ;;  %v1096_v41 = vsel %vm621_vm11, %v1088_v38, 0.0 }
 0x4e8   : > { %1097 = vadd.xlane.f32.xlu0 %v1096_v41 }
 0x4e9   : > { %v1083_v43 = vsel %vm608_vm3, %v1055_v33, %v1079_v40  ;;  %vm1126_vm3 = vcmask 1043459  }
 0x4ea   : > { %v1089_v4 = vsel %vm617_vm9, %v1083_v43, 0.0 }
 0x4eb   : > { %v1099_v18 = vsel %vm621_vm11, %v1089_v4, 0.0 }
 0x4ec   : > { %1100 = vadd.xlane.f32.xlu1 %v1099_v18 }
 0x569   : > { %v1092_v23 = vpop.xlane.xlu0 %1091 }
 0x56a   : > { %v1095_v35 = vpop.xlane.xlu1 %1094  ;;  %v1109_v46 = vrot.slane %v1092_v23, %v1108_v24 }
 0x56b   : > { %v1113_v47 = vrot.slane %v1095_v35, %v1108_v24 }
 0x56d   : > { %v1123_v50 = vsel %vm1122_vm6, %v1113_v47, %v1109_v46 }
 0x571   : > { %v1098_v45 = vpop.xlane.xlu0 %1097 }
 0x572   : > { %v1117_v48 = vrot.slane %v1098_v45, %v1108_v24 }
 0x574   : > { %v1125_v51 = vsel %vm1124_vm8, %v1117_v48, %v1123_v50 }
 0x575   : > { %v1101_v49 = vpop.xlane.xlu1 %1100 }
 0x576   : > { %v1121_v31 = vrot.slane %v1101_v49, %v1108_v24 }
 0x578   : > { %v1127_v62 = vsel %vm1126_vm3, %v1121_v31, %v1125_v51 }
 0x579   : > { %1129 = vst.msk [vmem:[%s112_s26] sm:$0xf] %vm626_vm12, %v1127_v62 }
 0x57a   : > { %1354 = shalt.err (!%p1351_p3)
}
 0x57b   : > { %s1355_s11 = scalar_lea.hbm %s1871_s30, 64  ;;  %s1359_s18 = scalar_lea.hbm %s1908_s1, 128 }
 0x57c   : > { %p1356_p4 = scmp.ne.s32.totalorder %s1871_s30, %s1355_s11  ;;  %p1360_p9 = scmp.lt.s32.totalorder %s1871_s30, %s1908_s1 }
 0x57d   : > { %p1361_p10 = scmp.lt.s32.totalorder %s1359_s18, %s1355_s11 }
 0x57e   : > { %p1357_p7 = pnand %p1356_p4, %p1454_p5 }
 0x57f   : > { %p1362_p11 = por %p1361_p10, %p1360_p9 }
 0x580   : > { %p1358_p8 = pneg %p1357_p7 }
 0x582   : > { %p1363_p12 = pnand %p1362_p11, %p1358_p8 }
 0x584   : > { %1366 = shalt.err (!%p1363_p12)
}
 0x585   : > { %1260 = dma.vmem_to_hbm [thread:$0]  (%p1454_p5), %s1145_s27, 64, %s1871_s30, %s1131_s2  }
 0x586 PF: > { %p1266_p13 = scmp.ge.s32.totalorder %s1401_s9, 2  ;;  %s1156_s21 = sand.u32 1, %s1389_s6  }
 0x587   : > { %s1157_s22 = scalar_lea.sflag [#allocation4], %s1156_s21 }
 0x588   : > { %p1263_p0 = pnand %p1266_p13, %p1458_p6 }
 0x58a   : > { %p1264_p1 = pneg %p1263_p0 }
 0x58c   : > { %1384 = dma.done.wait (%p1264_p1), %s1157_s22, 64  }
 0x58d   : > { %1386 = vsyncadd (%p1264_p1), %s1157_s22, 4294967232  ;;  %p11_p2 = scmp.ge.s32.totalorder %s1441_s12, 4   ;;  %s1911_s6 = smov %s1393_s7 }
 0x58e   : > { %s1912_s7 = smov %s1397_s8  ;;  %s1913_s8 = smov %s1452_s15 }
 0x58f   : > { %s1914_s9 = smov %s1441_s12  ;;  %13 = sbr.rel (!%p11_p2) target bundleno = 3 (0x3), region = 59 }
 0x594   :  { %1162 = vsyncpa [#allocation4], 1 }
 0x595   :  { %1164 = vsyncpa [#allocation4 + $0x1], 1 }

</bundles_post_ra>
